<compile_context>
chip_gen: v7x
topology: tpu7x:2x2x1
jax: 0.10.0
libtpu: 0.0.40
codegen_flags: <defaults>
</compile_context>

<pallas_src>
import jax
import jax.numpy as jnp
from jax.experimental import pallas as pl
from jax.experimental.pallas import tpu as pltpu


def mean_conv_kernel(x_ref, w_ref, b_ref, o_ref):
    # x_ref: (1, C_in, HW)  one batch element, NCHW flattened over H*W
    # w_ref: (C_out, C_in)  1x1-conv weight in its native layout
    # b_ref: (C_out, 1)
    # o_ref: (1, C_out, 1)
    x = x_ref[0]                      # (C_in, HW)
    hw = x.shape[-1]                  # static

    # Spatial sum on the MXU (standard NN-form matmul, no XLU reduce):
    #   colsum[c, 0] = sum_hw x[c, hw]
    ones_col = jnp.ones((hw, 1), dtype=jnp.float32)
    colsum = jnp.dot(x, ones_col, preferred_element_type=jnp.float32)      # (C_in, 1)

    # 1x1 conv == channel contraction, also on the MXU, weight stays (C_out, C_in).
    out = jnp.dot(w_ref[...], colsum, preferred_element_type=jnp.float32)  # (C_out, 1)

    # Apply the 1/(H*W) mean scale on the 20-wide result, then bias.
    o_ref[0] = ((1.0 / hw) * out + b_ref[...]).astype(o_ref.dtype)


def mean_conv2d(x, weight, bias):
    """x: (N, C_in, H, W) f32; weight: (C_out, C_in, 1, 1) f32; bias: (C_out,) f32."""
    N, C_in, H, W = x.shape
    C_out = weight.shape[0]
    HW = H * W

    x_flat = x.reshape(N, C_in, HW)        # pure reshape (contiguous), no transpose
    w2d = weight.reshape(C_out, C_in)      # keep (C_out, C_in): no wrapper transpose
    b2d = bias.reshape(C_out, 1)

    out = pl.pallas_call(
        mean_conv_kernel,
        out_shape=jax.ShapeDtypeStruct((N, C_out, 1), jnp.float32),
        grid=(N,),
        in_specs=[
            # Full-extent blocks in the last two dims -> (8,128) tiling rules
            # are satisfied (full-dim blocks), ~376 KB of x per step.
            pl.BlockSpec((1, C_in, HW), lambda n: (n, 0, 0)),
            pl.BlockSpec((C_out, C_in), lambda n: (0, 0)),
            pl.BlockSpec((C_out, 1), lambda n: (0, 0)),
        ],
        out_specs=pl.BlockSpec((1, C_out, 1), lambda n: (n, 0, 0)),
        compiler_params=pltpu.CompilerParams(
            # Batch axis is independent: shards across TensorCores on v7x when
            # N > 1; for N == 1 it is a single grid step either way.
            dimension_semantics=("parallel",),
        ),
    )(x_flat, w2d, b2d)

    return out.reshape(N, C_out, 1, 1)


if __name__ == "__main__":
    key = jax.random.PRNGKey(0)
    kx, kw, kb = jax.random.split(key, 3)

    # Shapes implied by the module's forward pass.
    N, C_in, H, W = 1, 480, 14, 14
    C_out = 20

    x = jax.random.normal(kx, (N, C_in, H, W), dtype=jnp.float32)
    # Deterministic synthetic parameters (shapes match Conv2d(480, 20, 1)).
    weight = jax.random.normal(kw, (C_out, C_in, 1, 1), dtype=jnp.float32) * 0.05
    bias = jax.random.normal(kb, (C_out,), dtype=jnp.float32) * 0.05

    y = mean_conv2d(x, weight, bias)
    y = jax.block_until_ready(y)

    # Pure-JAX reference (mean over H,W then 1x1 conv).
    m_ref = jnp.mean(x, axis=(2, 3))                                        # (N, C_in)
    y_ref = (m_ref @ weight.reshape(C_out, C_in).T + bias).reshape(N, C_out, 1, 1)

    assert y.shape == (N, C_out, 1, 1), y.shape
    assert jnp.allclose(y, y_ref, atol=1e-4, rtol=1e-4), "mismatch vs reference"

    print("KERNEL_OK")
</pallas_src>

<mosaic_0001>
module attributes {stable_mosaic.version = 11 : i64} {
  func.func @mean_conv_kernel(%arg0: i32, %arg1: memref<1x480x196xf32, #tpu.memory_space<vmem>>, %arg2: memref<20x480xf32, #tpu.memory_space<vmem>>, %arg3: memref<20x1xf32, #tpu.memory_space<vmem>>, %arg4: memref<1x20x1xf32, #tpu.memory_space<vmem>>) attributes {dimension_semantics = [#tpu.dimension_semantics<parallel>], iteration_bounds = array<i64: 1>, scalar_prefetch = 0 : i64, scratch_operands = 0 : i64, tpu.core_type = #tpu.core_type<tc>, window_params = [{transform_indices = @transform_0, window_bounds = array<i64: 1, 480, 196>}, {pipeline_mode = #tpu.pipeline_mode<synchronous>, transform_indices = @transform_1, window_bounds = array<i64: 20, 480>}, {pipeline_mode = #tpu.pipeline_mode<synchronous>, transform_indices = @transform_2, window_bounds = array<i64: 20, 1>}, {transform_indices = @transform_3, window_bounds = array<i64: 1, 20, 1>}]} {
    %c0 = arith.constant 0 : index
    %c0_0 = arith.constant 0 : index
    %c0_1 = arith.constant 0 : index
    %0 = vector.load %arg1[%c0, %c0_0, %c0_1] : memref<1x480x196xf32, #tpu.memory_space<vmem>>, vector<1x480x196xf32>
    %1 = vector.shape_cast %0 : vector<1x480x196xf32> to vector<480x196xf32>
    %cst = arith.constant 1.000000e+00 : f32
    %2 = vector.broadcast %cst : f32 to vector<196x1xf32>
    %cst_2 = arith.constant dense<0.000000e+00> : vector<480x1xf32>
    %3 = tpu.matmul %1, %2, %cst_2 {dimension_numbers = #tpu.dot_dimension_numbers<[1], [0], [0], [1], [0, 0, 1, 1], [], []>} : vector<480x196xf32>, vector<196x1xf32>, vector<480x1xf32> -> vector<480x1xf32>
    %c0_3 = arith.constant 0 : index
    %c0_4 = arith.constant 0 : index
    %4 = vector.load %arg2[%c0_3, %c0_4] : memref<20x480xf32, #tpu.memory_space<vmem>>, vector<20x480xf32>
    %cst_5 = arith.constant dense<0.000000e+00> : vector<20x1xf32>
    %5 = tpu.matmul %4, %3, %cst_5 {dimension_numbers = #tpu.dot_dimension_numbers<[1], [0], [0], [1], [0, 0, 1, 1], [], []>} : vector<20x480xf32>, vector<480x1xf32>, vector<20x1xf32> -> vector<20x1xf32>
    %cst_6 = arith.constant 0.00510204071 : f32
    %6 = vector.broadcast %cst_6 : f32 to vector<20x1xf32>
    %7 = arith.mulf %6, %5 : vector<20x1xf32>
    %c0_7 = arith.constant 0 : index
    %c0_8 = arith.constant 0 : index
    %8 = vector.load %arg3[%c0_7, %c0_8] : memref<20x1xf32, #tpu.memory_space<vmem>>, vector<20x1xf32>
    %9 = arith.addf %7, %8 : vector<20x1xf32>
    %c0_9 = arith.constant 0 : index
    %c0_10 = arith.constant 0 : index
    %c0_11 = arith.constant 0 : index
    %10 = vector.load %arg4[%c0_9, %c0_10, %c0_11] : memref<1x20x1xf32, #tpu.memory_space<vmem>>, vector<1x20x1xf32>
    %11 = vector.shape_cast %10 : vector<1x20x1xf32> to vector<20x1xf32>
    %12 = vector.shape_cast %9 : vector<20x1xf32> to vector<1x20x1xf32>
    tpu.vector_store %arg4[%c0_9, %c0_10, %c0_11], %12 {strides = array<i32>} : memref<1x20x1xf32, #tpu.memory_space<vmem>>, vector<1x20x1xf32>,
    return
  }
  func.func @transform_0(%arg0: i32) -> (i32, i32, i32) {
    %c0_i32 = arith.constant 0 : i32
    %c0_i32_0 = arith.constant 0 : i32
    %c0_i32_1 = arith.constant 0 : i32
    return %arg0, %c0_i32, %c0_i32_0 : i32, i32, i32
  }
  func.func @transform_1(%arg0: i32) -> (i32, i32) {
    %c0_i32 = arith.constant 0 : i32
    %c0_i32_0 = arith.constant 0 : i32
    %c0_i32_1 = arith.constant 0 : i32
    return %c0_i32, %c0_i32_0 : i32, i32
  }
  func.func @transform_2(%arg0: i32) -> (i32, i32) {
    %c0_i32 = arith.constant 0 : i32
    %c0_i32_0 = arith.constant 0 : i32
    %c0_i32_1 = arith.constant 0 : i32
    return %c0_i32, %c0_i32_0 : i32, i32
  }
  func.func @transform_3(%arg0: i32) -> (i32, i32, i32) {
    %c0_i32 = arith.constant 0 : i32
    %c0_i32_0 = arith.constant 0 : i32
    %c0_i32_1 = arith.constant 0 : i32
    return %arg0, %c0_i32, %c0_i32_0 : i32, i32, i32
  }
}

</mosaic_0001>

<bundles_post_ra>
// kernel: tpu_custom_call.1
= control target key start
LH: loop header
LB: loop body
LE: loop exit
PB: predicated region body
PF: predicated region fallthrough
CT: control target
= control target key end

     0   :  { %v1117_v0 = vmov 0.0|0.0   ;;  %vm134_vm0 = vcmask 556032   ;;  %v1118_v2 = vmov 1.0|1.0   ;;  %v1119_v4 = vmov 0.0   ;;  %s1821_s0 = inlined_call_operand.vmem [shape: f32[1,480,196], index: 0, kind: input, shape index: {}]   ;;  %s1822_s1 = inlined_call_operand.vmem [shape: f32[20,480], index: 1, kind: input, shape index: {}]   ;;  %s1823_s2 = inlined_call_operand.vmem [shape: f32[20,1], index: 2, kind: input, shape index: {}]   ;;  %s1824_s3 = inlined_call_operand.vmem [shape: f32[1,20,1], index: 3, kind: output, shape index: {}]  }
   0x1   :  { %989 = vmatprep.subr.bf16.mxu0 %v1117_v0  ;;  %v15_v1 = vld [vmem:[%s1821_s0 + $0x8] sm:$0xff]  ;;  %1087 = vmatprep.subr.bf16.mxu1 %v1117_v0  ;;  %v93_v3 = vld [vmem:[%s1821_s0 + $0x278] sm:$0xff]  ;;  %vm315_vm1 = vcmask 1043456   ;;  %v14_v5 = vld [vmem:[%s1821_s0] sm:$0xff]  ;;  %v1120_v8 = vmov 1.0   ;;  %vm696_vm2 = vcmask 785408  }
   0x2   :  { %990 = vmatpush1.bf16.msra.mxu0 %v1118_v2  ;;  %885 = vmatprep.mubr.msk.f32.mxu0 %vm134_vm0, %v15_v1  ;;  %v17_v6 = vld [vmem:[%s1821_s0 + $0x18] sm:$0xff]  ;;  %v92_v7 = vld [vmem:[%s1821_s0 + $0x270] sm:$0xff]  ;;  %v95_v9 = vld [vmem:[%s1821_s0 + $0x288] sm:$0xff]  ;;  %vm875_vm3 = vcmask 7168   ;;  %vm878_vm4 = vcmask 3072  }
   0x3   :  { %991 = vmatprep.subr.bf16.mxu0 %v1117_v0  ;;  %1100 = vmatpush1.bf16.msra.mxu1 %v1118_v2  ;;  %v16_v10 = vld [vmem:[%s1821_s0 + $0x10] sm:$0xff]  ;;  %v19_v11 = vld [vmem:[%s1821_s0 + $0x28] sm:$0xff]  ;;  %v94_v12 = vld [vmem:[%s1821_s0 + $0x280] sm:$0xff] }
   0x4   :  { %1088 = vmatprep.subr.bf16.mxu1 %v1117_v0  ;;  %924 = vmatprep.mubr.msk.f32.mxu1 %vm134_vm0, %v93_v3  ;;  %v97_v13 = vld [vmem:[%s1821_s0 + $0x298] sm:$0xff]  ;;  %v18_v14 = vld [vmem:[%s1821_s0 + $0x20] sm:$0xff]  ;;  %v96_v16 = vld [vmem:[%s1821_s0 + $0x290] sm:$0xff] }
   0x5   :  { %v21_v15 = vld [vmem:[%s1821_s0 + $0x38] sm:$0xff]  ;;  %v99_v17 = vld [vmem:[%s1821_s0 + $0x2a8] sm:$0xff]  ;;  %v20_v18 = vld [vmem:[%s1821_s0 + $0x30] sm:$0xff] }
   0x6   :  { %992 = vmatpush1.bf16.msra.mxu0 %v1118_v2  ;;  %v23_v19 = vld [vmem:[%s1821_s0 + $0x48] sm:$0xff]  ;;  %v98_v20 = vld [vmem:[%s1821_s0 + $0x2a0] sm:$0xff]  ;;  %v101_v21 = vld [vmem:[%s1821_s0 + $0x2b8] sm:$0xff] }
   0x7   :  { %993 = vmatprep.subr.bf16.mxu0 %v1117_v0  ;;  %1101 = vmatpush1.bf16.msra.mxu1 %v1118_v2  ;;  %v22_v22 = vld [vmem:[%s1821_s0 + $0x40] sm:$0xff]  ;;  %v25_v23 = vld [vmem:[%s1821_s0 + $0x58] sm:$0xff]  ;;  %v100_v24 = vld [vmem:[%s1821_s0 + $0x2b0] sm:$0xff] }
   0x8   :  { %1089 = vmatprep.subr.bf16.mxu1 %v1117_v0  ;;  %v103_v25 = vld [vmem:[%s1821_s0 + $0x2c8] sm:$0xff]  ;;  %v24_v26 = vld [vmem:[%s1821_s0 + $0x50] sm:$0xff]  ;;  %v102_v28 = vld [vmem:[%s1821_s0 + $0x2c0] sm:$0xff] }
   0x9   :  { %v27_v27 = vld [vmem:[%s1821_s0 + $0x68] sm:$0xff]  ;;  %v105_v29 = vld [vmem:[%s1821_s0 + $0x2d8] sm:$0xff]  ;;  %v26_v30 = vld [vmem:[%s1821_s0 + $0x60] sm:$0xff] }
   0xa   :  { %994 = vmatpush1.bf16.msra.mxu0 %v1118_v2  ;;  %v29_v31 = vld [vmem:[%s1821_s0 + $0x78] sm:$0xff]  ;;  %v104_v32 = vld [vmem:[%s1821_s0 + $0x2d0] sm:$0xff]  ;;  %v107_v33 = vld [vmem:[%s1821_s0 + $0x2e8] sm:$0xff] }
   0xb   :  { %995 = vmatprep.subr.bf16.mxu0 %v1117_v0  ;;  %1102 = vmatpush1.bf16.msra.mxu1 %v1118_v2  ;;  %v28_v34 = vld [vmem:[%s1821_s0 + $0x70] sm:$0xff]  ;;  %v31_v35 = vld [vmem:[%s1821_s0 + $0x88] sm:$0xff]  ;;  %v106_v36 = vld [vmem:[%s1821_s0 + $0x2e0] sm:$0xff] }
   0xc   :  { %1090 = vmatprep.subr.bf16.mxu1 %v1117_v0  ;;  %v109_v37 = vld [vmem:[%s1821_s0 + $0x2f8] sm:$0xff]  ;;  %v30_v38 = vld [vmem:[%s1821_s0 + $0x80] sm:$0xff]  ;;  %v108_v40 = vld [vmem:[%s1821_s0 + $0x2f0] sm:$0xff] }
   0xd   :  { %v33_v39 = vld [vmem:[%s1821_s0 + $0x98] sm:$0xff]  ;;  %v111_v41 = vld [vmem:[%s1821_s0 + $0x308] sm:$0xff]  ;;  %v32_v42 = vld [vmem:[%s1821_s0 + $0x90] sm:$0xff] }
   0xe   :  { %996 = vmatpush1.bf16.msra.mxu0 %v1118_v2  ;;  %v35_v43 = vld [vmem:[%s1821_s0 + $0xa8] sm:$0xff]  ;;  %v110_v44 = vld [vmem:[%s1821_s0 + $0x300] sm:$0xff]  ;;  %v113_v45 = vld [vmem:[%s1821_s0 + $0x318] sm:$0xff] }
   0xf   :  { %997 = vmatprep.subr.bf16.mxu0 %v1117_v0  ;;  %1103 = vmatpush1.bf16.msra.mxu1 %v1118_v2  ;;  %v34_v46 = vld [vmem:[%s1821_s0 + $0xa0] sm:$0xff]  ;;  %v37_v47 = vld [vmem:[%s1821_s0 + $0xb8] sm:$0xff]  ;;  %v112_v48 = vld [vmem:[%s1821_s0 + $0x310] sm:$0xff] }
  0x10   :  { %1091 = vmatprep.subr.bf16.mxu1 %v1117_v0  ;;  %v115_v49 = vld [vmem:[%s1821_s0 + $0x328] sm:$0xff]  ;;  %v36_v50 = vld [vmem:[%s1821_s0 + $0xb0] sm:$0xff]  ;;  %v114_v52 = vld [vmem:[%s1821_s0 + $0x320] sm:$0xff] }
  0x11   :  { %v39_v51 = vld [vmem:[%s1821_s0 + $0xc8] sm:$0xff]  ;;  %v117_v53 = vld [vmem:[%s1821_s0 + $0x338] sm:$0xff]  ;;  %v38_v54 = vld [vmem:[%s1821_s0 + $0xc0] sm:$0xff] }
  0x12   :  { %998 = vmatpush1.bf16.msra.mxu0 %v1118_v2  ;;  %v41_v55 = vld [vmem:[%s1821_s0 + $0xd8] sm:$0xff]  ;;  %v116_v56 = vld [vmem:[%s1821_s0 + $0x330] sm:$0xff]  ;;  %v119_v57 = vld [vmem:[%s1821_s0 + $0x348] sm:$0xff] }
  0x13   :  { %999 = vmatprep.subr.bf16.mxu0 %v1117_v0  ;;  %1104 = vmatpush1.bf16.msra.mxu1 %v1118_v2  ;;  %v40_v58 = vld [vmem:[%s1821_s0 + $0xd0] sm:$0xff]  ;;  %v43_v59 = vld [vmem:[%s1821_s0 + $0xe8] sm:$0xff]  ;;  %v118_v60 = vld [vmem:[%s1821_s0 + $0x340] sm:$0xff] }
  0x14   :  { %1092 = vmatprep.subr.bf16.mxu1 %v1117_v0  ;;  %v121_v61 = vld [vmem:[%s1821_s0 + $0x358] sm:$0xff]  ;;  %v42_v62 = vld [vmem:[%s1821_s0 + $0xe0] sm:$0xff]  ;;  %v120_v1 = vld [vmem:[%s1821_s0 + $0x350] sm:$0xff] }
  0x15   :  { %v45_v63 = vld [vmem:[%s1821_s0 + $0xf8] sm:$0xff]  ;;  %v44_v3 = vld [vmem:[%s1821_s0 + $0xf0] sm:$0xff] }
  0x16   :  { %1000 = vmatpush1.bf16.msra.mxu0 %v1118_v2 }
  0x17   :  { %1001 = vmatprep.subr.bf16.mxu0 %v1117_v0  ;;  %1105 = vmatpush1.bf16.msra.mxu1 %v1118_v2 }
  0x18   :  { %1093 = vmatprep.subr.bf16.mxu1 %v1117_v0 }
  0x1a   :  { %1002 = vmatpush1.bf16.msra.mxu0 %v1118_v2 }
  0x1b   :  { %1003 = vmatprep.subr.bf16.mxu0 %v1117_v0  ;;  %1106 = vmatpush1.bf16.msra.mxu1 %v1118_v2 }
  0x1c   :  { %1094 = vmatprep.subr.bf16.mxu1 %v1117_v0 }
  0x1e   :  { %1004 = vmatpush1.bf16.msra.mxu0 %v1118_v2 }
  0x1f   :  { %1005 = vmatprep.subr.bf16.mxu0 %v1117_v0  ;;  %1107 = vmatpush1.bf16.msra.mxu1 %v1118_v2 }
  0x20   :  { %1095 = vmatprep.subr.bf16.mxu1 %v1117_v0 }
  0x22   :  { %1006 = vmatpush1.bf16.msra.mxu0 %v1118_v2 }
  0x23   :  { %1007 = vmatprep.subr.bf16.mxu0 %v1117_v0  ;;  %1108 = vmatpush1.bf16.msra.mxu1 %v1118_v2 }
  0x24   :  { %1096 = vmatprep.subr.bf16.mxu1 %v1117_v0 }
  0x26   :  { %1008 = vmatpush1.bf16.msra.mxu0 %v1118_v2 }
  0x27   :  { %1009 = vmatprep.subr.bf16.mxu0 %v1117_v0  ;;  %1109 = vmatpush1.bf16.msra.mxu1 %v1118_v2 }
  0x28   :  { %1097 = vmatprep.subr.bf16.mxu1 %v1117_v0 }
  0x2a   :  { %1010 = vmatpush1.bf16.msra.mxu0 %v1118_v2 }
  0x2b   :  { %1011 = vmatprep.subr.bf16.mxu0 %v1117_v0  ;;  %1110 = vmatpush1.bf16.msra.mxu1 %v1118_v2 }
  0x2c   :  { %1098 = vmatprep.subr.bf16.mxu1 %v1117_v0 }
  0x2e   :  { %1012 = vmatpush1.bf16.msra.mxu0 %v1118_v2 }
  0x2f   :  { %367 = vmatprep.subr.mxu0 %v1119_v4  ;;  %1111 = vmatpush1.bf16.msra.mxu1 %v1118_v2  ;;  %v123_v2 = vld [vmem:[%s1821_s0 + $0x368] sm:$0xff] }
  0x30   :  { %1099 = vmatprep.subr.mxu1 %v1119_v4  ;;  %v47_v4 = vld [vmem:[%s1821_s0 + $0x108] sm:$0xff] }
  0x32   :  { %884 = vmatpush1.msk.msra.mxu0 %vm315_vm1, %v1120_v8 }
  0x33   :  { %384 = vmatmul.mubr.f32.vlgmr.msra.gmra.mrb[0].mxu0 %v14_v5  ;;  %1112 = vmatpush1.msk.msra.mxu1 %vm315_vm1, %v1120_v8  ;;  %v122_v5 = vld [vmem:[%s1821_s0 + $0x360] sm:$0xff]  ;;  %v49_v8 = vld [vmem:[%s1821_s0 + $0x118] sm:$0xff] }
  0x34   :  { %886 = vmatprep.mubr.msk.f32.mxu0 %vm134_vm0, %v17_v6  ;;  %579 = vmatmul.mubr.f32.vlgmr.msra.gmra.mrb[0].mxu1 %v92_v7  ;;  %v125_v6 = vld [vmem:[%s1821_s0 + $0x378] sm:$0xff]  ;;  %v46_v7 = vld [vmem:[%s1821_s0 + $0x100] sm:$0xff] }
  0x35   :  { %925 = vmatprep.mubr.msk.f32.mxu1 %vm134_vm0, %v95_v9  ;;  %v124_v9 = vld [vmem:[%s1821_s0 + $0x370] sm:$0xff] }
  0x37   :  { %389 = vmatmul.mubr.f32.gmra.mrb[2].mxu0 %v16_v10  ;;  %v127_v10 = vld [vmem:[%s1821_s0 + $0x388] sm:$0xff] }
  0x38   :  { %887 = vmatprep.mubr.msk.f32.mxu0 %vm134_vm0, %v19_v11  ;;  %584 = vmatmul.mubr.f32.gmra.mrb[2].mxu1 %v94_v12  ;;  %v48_v11 = vld [vmem:[%s1821_s0 + $0x110] sm:$0xff]  ;;  %v51_v12 = vld [vmem:[%s1821_s0 + $0x128] sm:$0xff] }
  0x39   :  { %926 = vmatprep.mubr.msk.f32.mxu1 %vm134_vm0, %v97_v13  ;;  %v126_v13 = vld [vmem:[%s1821_s0 + $0x380] sm:$0xff] }
  0x3b   :  { %394 = vmatmul.mubr.f32.gmra.mrb[4].mxu0 %v18_v14  ;;  %v129_v14 = vld [vmem:[%s1821_s0 + $0x398] sm:$0xff] }
  0x3c   :  { %888 = vmatprep.mubr.msk.f32.mxu0 %vm134_vm0, %v21_v15  ;;  %589 = vmatmul.mubr.f32.gmra.mrb[4].mxu1 %v96_v16  ;;  %v50_v15 = vld [vmem:[%s1821_s0 + $0x120] sm:$0xff]  ;;  %v53_v16 = vld [vmem:[%s1821_s0 + $0x138] sm:$0xff] }
  0x3d   :  { %927 = vmatprep.mubr.msk.f32.mxu1 %vm134_vm0, %v99_v17  ;;  %v128_v17 = vld [vmem:[%s1821_s0 + $0x390] sm:$0xff] }
  0x3f   :  { %399 = vmatmul.mubr.f32.gmra.mrb[6].mxu0 %v20_v18  ;;  %v131_v18 = vld [vmem:[%s1821_s0 + $0x3a8] sm:$0xff] }
  0x40   :  { %889 = vmatprep.mubr.msk.f32.mxu0 %vm134_vm0, %v23_v19  ;;  %594 = vmatmul.mubr.f32.gmra.mrb[6].mxu1 %v98_v20  ;;  %v52_v19 = vld [vmem:[%s1821_s0 + $0x130] sm:$0xff]  ;;  %v55_v20 = vld [vmem:[%s1821_s0 + $0x148] sm:$0xff] }
  0x41   :  { %928 = vmatprep.mubr.msk.f32.mxu1 %vm134_vm0, %v101_v21  ;;  %v130_v21 = vld [vmem:[%s1821_s0 + $0x3a0] sm:$0xff] }
  0x43   :  { %404 = vmatmul.mubr.f32.gmra.mrb[8].mxu0 %v22_v22  ;;  %v133_v22 = vld [vmem:[%s1821_s0 + $0x3b8] sm:$0xff] }
  0x44   :  { %890 = vmatprep.mubr.msk.f32.mxu0 %vm134_vm0, %v25_v23  ;;  %599 = vmatmul.mubr.f32.gmra.mrb[8].mxu1 %v100_v24  ;;  %v54_v23 = vld [vmem:[%s1821_s0 + $0x140] sm:$0xff]  ;;  %v57_v24 = vld [vmem:[%s1821_s0 + $0x158] sm:$0xff] }
  0x45   :  { %929 = vmatprep.mubr.msk.f32.mxu1 %vm134_vm0, %v103_v25  ;;  %v132_v25 = vld [vmem:[%s1821_s0 + $0x3b0] sm:$0xff] }
  0x47   :  { %409 = vmatmul.mubr.f32.gmra.mrb[10].mxu0 %v24_v26  ;;  %v56_v26 = vld [vmem:[%s1821_s0 + $0x150] sm:$0xff] }
  0x48   :  { %891 = vmatprep.mubr.msk.f32.mxu0 %vm134_vm0, %v27_v27  ;;  %604 = vmatmul.mubr.f32.gmra.mrb[10].mxu1 %v102_v28  ;;  %v59_v27 = vld [vmem:[%s1821_s0 + $0x168] sm:$0xff]  ;;  %v58_v28 = vld [vmem:[%s1821_s0 + $0x160] sm:$0xff] }
  0x49   :  { %930 = vmatprep.mubr.msk.f32.mxu1 %vm134_vm0, %v105_v29  ;;  %v61_v29 = vld [vmem:[%s1821_s0 + $0x178] sm:$0xff] }
  0x4b   :  { %414 = vmatmul.mubr.f32.gmra.mrb[12].mxu0 %v26_v30  ;;  %v60_v30 = vld [vmem:[%s1821_s0 + $0x170] sm:$0xff] }
  0x4c   :  { %892 = vmatprep.mubr.msk.f32.mxu0 %vm134_vm0, %v29_v31  ;;  %609 = vmatmul.mubr.f32.gmra.mrb[12].mxu1 %v104_v32  ;;  %v63_v31 = vld [vmem:[%s1821_s0 + $0x188] sm:$0xff]  ;;  %v62_v32 = vld [vmem:[%s1821_s0 + $0x180] sm:$0xff] }
  0x4d   :  { %931 = vmatprep.mubr.msk.f32.mxu1 %vm134_vm0, %v107_v33  ;;  %v65_v33 = vld [vmem:[%s1821_s0 + $0x198] sm:$0xff] }
  0x4f   :  { %419 = vmatmul.mubr.f32.gmra.mrb[14].mxu0 %v28_v34  ;;  %v64_v34 = vld [vmem:[%s1821_s0 + $0x190] sm:$0xff] }
  0x50   :  { %893 = vmatprep.mubr.msk.f32.mxu0 %vm134_vm0, %v31_v35  ;;  %614 = vmatmul.mubr.f32.gmra.mrb[14].mxu1 %v106_v36  ;;  %v67_v35 = vld [vmem:[%s1821_s0 + $0x1a8] sm:$0xff]  ;;  %v66_v36 = vld [vmem:[%s1821_s0 + $0x1a0] sm:$0xff] }
  0x51   :  { %932 = vmatprep.mubr.msk.f32.mxu1 %vm134_vm0, %v109_v37  ;;  %v69_v37 = vld [vmem:[%s1821_s0 + $0x1b8] sm:$0xff] }
  0x53   :  { %424 = vmatmul.mubr.f32.gmra.mrb[16].mxu0 %v30_v38  ;;  %v68_v38 = vld [vmem:[%s1821_s0 + $0x1b0] sm:$0xff] }
  0x54   :  { %894 = vmatprep.mubr.msk.f32.mxu0 %vm134_vm0, %v33_v39  ;;  %619 = vmatmul.mubr.f32.gmra.mrb[16].mxu1 %v108_v40  ;;  %v71_v39 = vld [vmem:[%s1821_s0 + $0x1c8] sm:$0xff]  ;;  %v70_v40 = vld [vmem:[%s1821_s0 + $0x1c0] sm:$0xff] }
  0x55   :  { %933 = vmatprep.mubr.msk.f32.mxu1 %vm134_vm0, %v111_v41  ;;  %v73_v41 = vld [vmem:[%s1821_s0 + $0x1d8] sm:$0xff] }
  0x57   :  { %429 = vmatmul.mubr.f32.gmra.mrb[18].mxu0 %v32_v42  ;;  %v72_v42 = vld [vmem:[%s1821_s0 + $0x1d0] sm:$0xff] }
  0x58   :  { %895 = vmatprep.mubr.msk.f32.mxu0 %vm134_vm0, %v35_v43  ;;  %624 = vmatmul.mubr.f32.gmra.mrb[18].mxu1 %v110_v44  ;;  %v75_v43 = vld [vmem:[%s1821_s0 + $0x1e8] sm:$0xff]  ;;  %v74_v44 = vld [vmem:[%s1821_s0 + $0x1e0] sm:$0xff] }
  0x59   :  { %934 = vmatprep.mubr.msk.f32.mxu1 %vm134_vm0, %v113_v45  ;;  %v77_v45 = vld [vmem:[%s1821_s0 + $0x1f8] sm:$0xff] }
  0x5b   :  { %434 = vmatmul.mubr.f32.gmra.mrb[20].mxu0 %v34_v46  ;;  %v76_v46 = vld [vmem:[%s1821_s0 + $0x1f0] sm:$0xff] }
  0x5c   :  { %896 = vmatprep.mubr.msk.f32.mxu0 %vm134_vm0, %v37_v47  ;;  %629 = vmatmul.mubr.f32.gmra.mrb[20].mxu1 %v112_v48  ;;  %v79_v47 = vld [vmem:[%s1821_s0 + $0x208] sm:$0xff]  ;;  %v78_v48 = vld [vmem:[%s1821_s0 + $0x200] sm:$0xff] }
  0x5d   :  { %935 = vmatprep.mubr.msk.f32.mxu1 %vm134_vm0, %v115_v49  ;;  %v81_v49 = vld [vmem:[%s1821_s0 + $0x218] sm:$0xff] }
  0x5f   :  { %439 = vmatmul.mubr.f32.gmra.mrb[22].mxu0 %v36_v50  ;;  %v80_v50 = vld [vmem:[%s1821_s0 + $0x210] sm:$0xff] }
  0x60   :  { %897 = vmatprep.mubr.msk.f32.mxu0 %vm134_vm0, %v39_v51  ;;  %634 = vmatmul.mubr.f32.gmra.mrb[22].mxu1 %v114_v52  ;;  %v83_v51 = vld [vmem:[%s1821_s0 + $0x228] sm:$0xff]  ;;  %v82_v52 = vld [vmem:[%s1821_s0 + $0x220] sm:$0xff] }
  0x61   :  { %936 = vmatprep.mubr.msk.f32.mxu1 %vm134_vm0, %v117_v53  ;;  %v85_v53 = vld [vmem:[%s1821_s0 + $0x238] sm:$0xff] }
  0x63   :  { %444 = vmatmul.mubr.f32.gmra.mrb[24].mxu0 %v38_v54  ;;  %v84_v54 = vld [vmem:[%s1821_s0 + $0x230] sm:$0xff] }
  0x64   :  { %898 = vmatprep.mubr.msk.f32.mxu0 %vm134_vm0, %v41_v55  ;;  %639 = vmatmul.mubr.f32.gmra.mrb[24].mxu1 %v116_v56  ;;  %v87_v55 = vld [vmem:[%s1821_s0 + $0x248] sm:$0xff]  ;;  %v86_v56 = vld [vmem:[%s1821_s0 + $0x240] sm:$0xff] }
  0x65   :  { %937 = vmatprep.mubr.msk.f32.mxu1 %vm134_vm0, %v119_v57  ;;  %v89_v57 = vld [vmem:[%s1821_s0 + $0x258] sm:$0xff] }
  0x67   :  { %449 = vmatmul.mubr.f32.gmra.mrb[26].mxu0 %v40_v58  ;;  %v88_v58 = vld [vmem:[%s1821_s0 + $0x250] sm:$0xff] }
  0x68   :  { %899 = vmatprep.mubr.msk.f32.mxu0 %vm134_vm0, %v43_v59  ;;  %644 = vmatmul.mubr.f32.gmra.mrb[26].mxu1 %v118_v60  ;;  %v91_v59 = vld [vmem:[%s1821_s0 + $0x268] sm:$0xff]  ;;  %v90_v60 = vld [vmem:[%s1821_s0 + $0x260] sm:$0xff] }
  0x69   :  { %938 = vmatprep.mubr.msk.f32.mxu1 %vm134_vm0, %v121_v61 }
  0x6b   :  { %454 = vmatmul.mubr.f32.gmra.mrb[28].mxu0 %v42_v62 }
  0x6c   :  { %900 = vmatprep.mubr.msk.f32.mxu0 %vm134_vm0, %v45_v63  ;;  %649 = vmatmul.mubr.f32.gmra.mrb[28].mxu1 %v120_v1 }
  0x6d   :  { %939 = vmatprep.mubr.msk.f32.mxu1 %vm134_vm0, %v123_v2 }
  0x6f   :  { %459 = vmatmul.mubr.f32.gmra.mrb[30].mxu0 %v44_v3 }
  0x70   :  { %901 = vmatprep.mubr.msk.f32.mxu0 %vm134_vm0, %v47_v4  ;;  %654 = vmatmul.mubr.f32.gmra.mrb[30].mxu1 %v122_v5 }
  0x71   :  { %940 = vmatprep.mubr.msk.f32.mxu1 %vm134_vm0, %v125_v6  ;;  %v685_v6 = vld [vmem:[%s1822_s1 + $0x8] sm:$0xff] }
  0x73   :  { %464 = vmatmul.mubr.f32.gmra.mrb[32].mxu0 %v46_v7 }
  0x74   :  { %902 = vmatprep.mubr.msk.f32.mxu0 %vm134_vm0, %v49_v8  ;;  %659 = vmatmul.mubr.f32.gmra.mrb[32].mxu1 %v124_v9 }
  0x75   :  { %941 = vmatprep.mubr.msk.f32.mxu1 %vm134_vm0, %v127_v10 }
  0x77   :  { %469 = vmatmul.mubr.f32.gmra.mrb[34].mxu0 %v48_v11 }
  0x78   :  { %903 = vmatprep.mubr.msk.f32.mxu0 %vm134_vm0, %v51_v12  ;;  %664 = vmatmul.mubr.f32.gmra.mrb[34].mxu1 %v126_v13 }
  0x79   :  { %942 = vmatprep.mubr.msk.f32.mxu1 %vm134_vm0, %v129_v14 }
  0x7b   :  { %474 = vmatmul.mubr.f32.gmra.mrb[36].mxu0 %v50_v15 }
  0x7c   :  { %904 = vmatprep.mubr.msk.f32.mxu0 %vm134_vm0, %v53_v16  ;;  %669 = vmatmul.mubr.f32.gmra.mrb[36].mxu1 %v128_v17 }
  0x7d   :  { %943 = vmatprep.mubr.msk.f32.mxu1 %vm134_vm0, %v131_v18 }
  0x7f   :  { %479 = vmatmul.mubr.f32.gmra.mrb[38].mxu0 %v52_v19 }
  0x80   :  { %905 = vmatprep.mubr.msk.f32.mxu0 %vm134_vm0, %v55_v20  ;;  %674 = vmatmul.mubr.f32.gmra.mrb[38].mxu1 %v130_v21 }
  0x81   :  { %944 = vmatprep.mubr.msk.f32.mxu1 %vm134_vm0, %v133_v22 }
  0x83   :  { %484 = vmatmul.mubr.f32.gmra.mrb[40].mxu0 %v54_v23 }
  0x84   :  { %906 = vmatprep.mubr.msk.f32.mxu0 %vm134_vm0, %v57_v24  ;;  %679 = vmatmul.mubr.f32.gmra.mrb[40].mxu1 %v132_v25 }
  0x85   :  { %770 = vmatprep.mubr.f32.mxu1 %v685_v6 }
  0x87   :  { %489 = vmatmul.mubr.f32.gmra.mrb[42].mxu0 %v56_v26 }
  0x88   :  { %907 = vmatprep.mubr.msk.f32.mxu0 %vm134_vm0, %v59_v27 }
  0x8b   :  { %494 = vmatmul.mubr.f32.gmra.mrb[44].mxu0 %v58_v28 }
  0x8c   :  { %908 = vmatprep.mubr.msk.f32.mxu0 %vm134_vm0, %v61_v29 }
  0x8f   :  { %499 = vmatmul.mubr.f32.gmra.mrb[46].mxu0 %v60_v30 }
  0x90   :  { %909 = vmatprep.mubr.msk.f32.mxu0 %vm134_vm0, %v63_v31 }
  0x93   :  { %504 = vmatmul.mubr.f32.gmra.mrb[48].mxu0 %v62_v32 }
  0x94   :  { %910 = vmatprep.mubr.msk.f32.mxu0 %vm134_vm0, %v65_v33 }
  0x97   :  { %509 = vmatmul.mubr.f32.gmra.mrb[50].mxu0 %v64_v34 }
  0x98   :  { %911 = vmatprep.mubr.msk.f32.mxu0 %vm134_vm0, %v67_v35 }
  0x9b   :  { %514 = vmatmul.mubr.f32.gmra.mrb[52].mxu0 %v66_v36 }
  0x9c   :  { %912 = vmatprep.mubr.msk.f32.mxu0 %vm134_vm0, %v69_v37 }
  0x9f   :  { %519 = vmatmul.mubr.f32.gmra.mrb[54].mxu0 %v68_v38 }
  0xa0   :  { %913 = vmatprep.mubr.msk.f32.mxu0 %vm134_vm0, %v71_v39 }
  0xa3   :  { %524 = vmatmul.mubr.f32.gmra.mrb[56].mxu0 %v70_v40 }
  0xa4   :  { %914 = vmatprep.mubr.msk.f32.mxu0 %vm134_vm0, %v73_v41 }
  0xa7   :  { %529 = vmatmul.mubr.f32.gmra.mrb[58].mxu0 %v72_v42 }
  0xa8   :  { %915 = vmatprep.mubr.msk.f32.mxu0 %vm134_vm0, %v75_v43 }
  0xab   :  { %534 = vmatmul.mubr.f32.gmra.mrb[60].mxu0 %v74_v44 }
  0xac   :  { %916 = vmatprep.mubr.msk.f32.mxu0 %vm134_vm0, %v77_v45 }
  0xaf   :  { %539 = vmatmul.mubr.f32.gmra.mrb[62].mxu0 %v76_v46 }
  0xb0   :  { %917 = vmatprep.mubr.msk.f32.mxu0 %vm134_vm0, %v79_v47 }
  0xb3   :  { %544 = vmatmul.mubr.f32.gmra.mrb[64].mxu0 %v78_v48 }
  0xb4   :  { %918 = vmatprep.mubr.msk.f32.mxu0 %vm134_vm0, %v81_v49 }
  0xb7   :  { %549 = vmatmul.mubr.f32.gmra.mrb[66].mxu0 %v80_v50 }
  0xb8   :  { %919 = vmatprep.mubr.msk.f32.mxu0 %vm134_vm0, %v83_v51 }
  0xbb   :  { %554 = vmatmul.mubr.f32.gmra.mrb[68].mxu0 %v82_v52 }
  0xbc   :  { %920 = vmatprep.mubr.msk.f32.mxu0 %vm134_vm0, %v85_v53 }
  0xbf   :  { %559 = vmatmul.mubr.f32.gmra.mrb[70].mxu0 %v84_v54 }
  0xc0   :  { %921 = vmatprep.mubr.msk.f32.mxu0 %vm134_vm0, %v87_v55 }
  0xc3   :  { %564 = vmatmul.mubr.f32.gmra.mrb[72].mxu0 %v86_v56 }
  0xc4   :  { %922 = vmatprep.mubr.msk.f32.mxu0 %vm134_vm0, %v89_v57 }
  0xc7   :  { %569 = vmatmul.mubr.f32.gmra.mrb[74].mxu0 %v88_v58 }
  0xc8   :  { %923 = vmatprep.mubr.msk.f32.mxu0 %vm134_vm0, %v91_v59 }
  0xcb   :  { %574 = vmatmul.mubr.f32.gmra.mrb[76].mxu0 %v90_v60 }
 0x106   :  { %v1585_v61 = vpop.f32.mrb[0].mxu0 }
 0x107   :  { %v387_v62 = vpop.f32.mrb[1].mxu0  ;;  %v1587_v63 = vpop.f32.mrb[0].mxu1 }
 0x108   :  { %v582_v1 = vpop.f32.mrb[1].mxu1 }
 0x10a   :  { %v1589_v2 = vpop.f32.mrb[2].mxu0 }
 0x10b   :  { %v1015_v3 = vpack.c.bf16 %v1589_v2, %v1585_v61  ;;  %v392_v4 = vpop.f32.mrb[3].mxu0  ;;  %v1593_v5 = vpop.f32.mrb[2].mxu1 }
 0x10c   :  { %v587_v7 = vpop.f32.mrb[3].mxu1 }
 0x10e   :  { %v1598_v8 = vpop.f32.mrb[4].mxu0 }
 0x10f   :  { %v397_v9 = vpop.f32.mrb[5].mxu0  ;;  %v1600_v10 = vpop.f32.mrb[4].mxu1 }
 0x110   :  { %v1058_v11 = vpack.c.bf16 %v1600_v10, %v1593_v5  ;;  %v592_v12 = vpop.f32.mrb[5].mxu1  ;;  %v691_v5 = vld [vmem:[%s1822_s1 + $0x38] sm:$0xff]  ;;  %v690_v10 = vld [vmem:[%s1822_s1 + $0x30] sm:$0xff] }
 0x112   :  { %v1604_v13 = vpop.f32.mrb[6].mxu0 }
 0x113   :  { %v1019_v14 = vpack.c.bf16 %v1604_v13, %v1598_v8  ;;  %v402_v15 = vpop.f32.mrb[7].mxu0  ;;  %v1608_v16 = vpop.f32.mrb[6].mxu1 }
 0x114   :  { %v597_v17 = vpop.f32.mrb[7].mxu1 }
 0x116   :  { %v1610_v18 = vpop.f32.mrb[8].mxu0 }
 0x117   :  { %v407_v19 = vpop.f32.mrb[9].mxu0  ;;  %v1612_v20 = vpop.f32.mrb[8].mxu1 }
 0x118   :  { %v1061_v21 = vpack.c.bf16 %v1612_v20, %v1608_v16  ;;  %v602_v22 = vpop.f32.mrb[9].mxu1 }
 0x11a   :  { %v1616_v23 = vpop.f32.mrb[10].mxu0 }
 0x11b   :  { %v1023_v24 = vpack.c.bf16 %v1616_v23, %v1610_v18  ;;  %v412_v25 = vpop.f32.mrb[11].mxu0  ;;  %v1620_v26 = vpop.f32.mrb[10].mxu1 }
 0x11c   :  { %v607_v27 = vpop.f32.mrb[11].mxu1 }
 0x11e   :  { %v1622_v28 = vpop.f32.mrb[12].mxu0 }
 0x11f   :  { %v417_v29 = vpop.f32.mrb[13].mxu0  ;;  %v1624_v30 = vpop.f32.mrb[12].mxu1 }
 0x120   :  { %v1064_v31 = vpack.c.bf16 %v1624_v30, %v1620_v26  ;;  %v612_v32 = vpop.f32.mrb[13].mxu1 }
 0x122   :  { %v1628_v33 = vpop.f32.mrb[14].mxu0 }
 0x123   :  { %v1027_v34 = vpack.c.bf16 %v1628_v33, %v1622_v28  ;;  %v422_v35 = vpop.f32.mrb[15].mxu0  ;;  %v1632_v36 = vpop.f32.mrb[14].mxu1 }
 0x124   :  { %v617_v37 = vpop.f32.mrb[15].mxu1 }
 0x126   :  { %v1634_v38 = vpop.f32.mrb[16].mxu0 }
 0x127   :  { %v427_v39 = vpop.f32.mrb[17].mxu0  ;;  %v1636_v40 = vpop.f32.mrb[16].mxu1 }
 0x128   :  { %v1067_v41 = vpack.c.bf16 %v1636_v40, %v1632_v36  ;;  %v622_v42 = vpop.f32.mrb[17].mxu1 }
 0x12a   :  { %v1640_v43 = vpop.f32.mrb[18].mxu0 }
 0x12b   :  { %v1031_v44 = vpack.c.bf16 %v1640_v43, %v1634_v38  ;;  %v432_v45 = vpop.f32.mrb[19].mxu0  ;;  %v1644_v46 = vpop.f32.mrb[18].mxu1 }
 0x12c   :  { %v627_v47 = vpop.f32.mrb[19].mxu1 }
 0x12e   :  { %v1646_v48 = vpop.f32.mrb[20].mxu0 }
 0x12f   :  { %v437_v49 = vpop.f32.mrb[21].mxu0  ;;  %v1648_v50 = vpop.f32.mrb[20].mxu1 }
 0x130   :  { %v1070_v51 = vpack.c.bf16 %v1648_v50, %v1644_v46  ;;  %v632_v52 = vpop.f32.mrb[21].mxu1 }
 0x132   :  { %v1652_v53 = vpop.f32.mrb[22].mxu0 }
 0x133   :  { %v1035_v54 = vpack.c.bf16 %v1652_v53, %v1646_v48  ;;  %v442_v55 = vpop.f32.mrb[23].mxu0  ;;  %v1656_v56 = vpop.f32.mrb[22].mxu1  ;;  %v684_v53 = vld [vmem:[%s1822_s1] sm:$0xff] }
 0x134   :  { %v637_v57 = vpop.f32.mrb[23].mxu1 }
 0x136   :  { %v1658_v58 = vpop.f32.mrb[24].mxu0 }
 0x137   :  { %v447_v59 = vpop.f32.mrb[25].mxu0  ;;  %v1660_v60 = vpop.f32.mrb[24].mxu1 }
 0x138   :  { %v1073_v62 = vpack.c.bf16 %v1660_v60, %v1656_v56  ;;  %v642_v1 = vpop.f32.mrb[25].mxu1  ;;  %v869_v56 = vld [vmem:[%s1823_s2] sm:$0xff] }
 0x13a   :  { %v1664_v4 = vpop.f32.mrb[26].mxu0 }
 0x13b   :  { %v1039_v6 = vpack.c.bf16 %v1664_v4, %v1658_v58  ;;  %v452_v7 = vpop.f32.mrb[27].mxu0  ;;  %v1668_v9 = vpop.f32.mrb[26].mxu1  ;;  %v689_v58 = vld [vmem:[%s1822_s1 + $0x28] sm:$0xff] }
 0x13c   :  { %v647_v12 = vpop.f32.mrb[27].mxu1 }
 0x13e   :  { %v1670_v15 = vpop.f32.mrb[28].mxu0 }
 0x13f   :  { %v457_v17 = vpop.f32.mrb[29].mxu0  ;;  %v1672_v19 = vpop.f32.mrb[28].mxu1 }
 0x140   :  { %v1076_v22 = vpack.c.bf16 %v1672_v19, %v1668_v9  ;;  %v652_v25 = vpop.f32.mrb[29].mxu1 }
 0x142   :  { %v1676_v27 = vpop.f32.mrb[30].mxu0 }
 0x143   :  { %v1043_v29 = vpack.c.bf16 %v1676_v27, %v1670_v15  ;;  %v462_v32 = vpop.f32.mrb[31].mxu0  ;;  %v1680_v35 = vpop.f32.mrb[30].mxu1  ;;  %v688_v15 = vld [vmem:[%s1822_s1 + $0x20] sm:$0xff]  ;;  %v693_v27 = vld [vmem:[%s1822_s1 + $0x48] sm:$0xf] }
 0x144   :  { %v657_v37 = vpop.f32.mrb[31].mxu1 }
 0x146   :  { %v465_v39 = vpop.f32.mrb[32].mxu0 }
 0x147   :  { %v467_v42 = vpop.f32.mrb[33].mxu0  ;;  %v1682_v45 = vpop.f32.mrb[32].mxu1 }
 0x148   :  { %v1079_v47 = vpack.c.bf16 %v1682_v45, %v1680_v35  ;;  %v662_v49 = vpop.f32.mrb[33].mxu1  ;;  %v870_v35 = vld [vmem:[%s1823_s2 + $0x8] sm:$0xff] }
 0x14a   :  { %v470_v52 = vpop.f32.mrb[34].mxu0 }
 0x14b   :  { %v1013_v55 = vpack.c.bf16 %v470_v52, %v465_v39  ;;  %v472_v57 = vpop.f32.mrb[35].mxu0  ;;  %v1686_v59 = vpop.f32.mrb[34].mxu1 }
 0x14c   :  { %v667_v1 = vpop.f32.mrb[35].mxu1 }
 0x14d   :  { %1014 = vmatprep.subr.bf16.mxu1 %v1013_v55 }
 0x14e   :  { %1016 = vmatpush3.bf16.msra.mxu1 %v1015_v3  ;;  %v475_v7 = vpop.f32.mrb[36].mxu0 }
 0x14f   :  { %v477_v12 = vpop.f32.mrb[37].mxu0  ;;  %v1691_v17 = vpop.f32.mrb[36].mxu1 }
 0x150   :  { %v1082_v25 = vpack.c.bf16 %v1691_v17, %v1686_v59  ;;  %v672_v32 = vpop.f32.mrb[37].mxu1 }
 0x152   :  { %v480_v37 = vpop.f32.mrb[38].mxu0 }
 0x153   :  { %v1017_v42 = vpack.c.bf16 %v480_v37, %v475_v7  ;;  %v482_v39 = vpop.f32.mrb[39].mxu0  ;;  %v1695_v49 = vpop.f32.mrb[38].mxu1 }
 0x154   :  { %v677_v52 = vpop.f32.mrb[39].mxu1 }
 0x155   :  { %1018 = vmatprep.subr.bf16.mxu1 %v1017_v42 }
 0x156   :  { %1020 = vmatpush3.bf16.msra.mxu1 %v1019_v14  ;;  %v485_v61 = vpop.f32.mrb[40].mxu0 }
 0x157   :  { %v487_v2 = vpop.f32.mrb[41].mxu0  ;;  %v1700_v3 = vpop.f32.mrb[40].mxu1 }
 0x158   :  { %v1085_v55 = vpack.c.bf16 %v1700_v3, %v1695_v49  ;;  %v682_v57 = vpop.f32.mrb[41].mxu1  ;;  %v871_v49 = vld [vmem:[%s1823_s2 + $0x10] sm:$0xf] }
 0x15a   :  { %v490_v1 = vpop.f32.mrb[42].mxu0 }
 0x15b   :  { %v1021_v12 = vpack.c.bf16 %v490_v1, %v485_v61  ;;  %v492_v7 = vpop.f32.mrb[43].mxu0 }
 0x15d   :  { %1022 = vmatprep.subr.bf16.mxu1 %v1021_v12 }
 0x15e   :  { %1024 = vmatpush3.bf16.msra.mxu1 %v1023_v24  ;;  %v495_v32 = vpop.f32.mrb[44].mxu0 }
 0x15f   :  { %v497_v37 = vpop.f32.mrb[45].mxu0 }
 0x162   :  { %v500_v8 = vpop.f32.mrb[46].mxu0 }
 0x163   :  { %v1025_v13 = vpack.c.bf16 %v500_v8, %v495_v32  ;;  %v502_v14 = vpop.f32.mrb[47].mxu0 }
 0x164   :  { %v692_v14 = vld [vmem:[%s1822_s1 + $0x40] sm:$0xf] }
 0x165   :  { %1026 = vmatprep.subr.bf16.mxu1 %v1025_v13 }
 0x166   :  { %1028 = vmatpush3.bf16.msra.mxu1 %v1027_v34  ;;  %v505_v42 = vpop.f32.mrb[48].mxu0 }
 0x167   :  { %v507_v39 = vpop.f32.mrb[49].mxu0 }
 0x16a   :  { %v510_v52 = vpop.f32.mrb[50].mxu0 }
 0x16b   :  { %v1029_v61 = vpack.c.bf16 %v510_v52, %v505_v42  ;;  %v512_v2 = vpop.f32.mrb[51].mxu0  ;;  %v687_v42 = vld [vmem:[%s1822_s1 + $0x18] sm:$0xff] }
 0x16d   :  { %1030 = vmatprep.subr.bf16.mxu1 %v1029_v61 }
 0x16e   :  { %1032 = vmatpush3.bf16.msra.mxu1 %v1031_v44  ;;  %v515_v18 = vpop.f32.mrb[52].mxu0 }
 0x16f   :  { %v517_v23 = vpop.f32.mrb[53].mxu0 }
 0x172   :  { %v520_v24 = vpop.f32.mrb[54].mxu0 }
 0x173   :  { %v1033_v57 = vpack.c.bf16 %v520_v24, %v515_v18  ;;  %v522_v1 = vpop.f32.mrb[55].mxu0 }
 0x175   :  { %1034 = vmatprep.subr.bf16.mxu1 %v1033_v57 }
 0x176   :  { %1036 = vmatpush3.bf16.msra.mxu1 %v1035_v54  ;;  %v525_v28 = vpop.f32.mrb[56].mxu0 }
 0x177   :  { %v527_v33 = vpop.f32.mrb[57].mxu0 }
 0x17a   :  { %v530_v34 = vpop.f32.mrb[58].mxu0 }
 0x17b   :  { %v1037_v12 = vpack.c.bf16 %v530_v34, %v525_v28  ;;  %v532_v7 = vpop.f32.mrb[59].mxu0 }
 0x17d   :  { %1038 = vmatprep.subr.bf16.mxu1 %v1037_v12 }
 0x17e   :  { %1040 = vmatpush3.bf16.msra.mxu1 %v1039_v6  ;;  %v535_v38 = vpop.f32.mrb[60].mxu0 }
 0x17f   :  { %v537_v43 = vpop.f32.mrb[61].mxu0 }
 0x182   :  { %v540_v44 = vpop.f32.mrb[62].mxu0 }
 0x183   :  { %v1041_v32 = vpack.c.bf16 %v540_v44, %v535_v38  ;;  %v542_v37 = vpop.f32.mrb[63].mxu0 }
 0x185   :  { %1042 = vmatprep.subr.bf16.mxu1 %v1041_v32 }
 0x186   :  { %1044 = vmatpush3.bf16.msra.mxu1 %v1043_v29  ;;  %v545_v48 = vpop.f32.mrb[64].mxu0 }
 0x187   :  { %v547_v54 = vpop.f32.mrb[65].mxu0  ;;  %1045 = vmatprep.subr.bf16.mxu1 %v1117_v0 }
 0x189   :  { %771 = vmatmul.mubr.f32.vlgmr.msra.gmra.mrb[42].mxu1 %v684_v53 }
 0x18a   :  { %v550_v4 = vpop.f32.mrb[66].mxu0  ;;  %775 = vmatprep.mubr.f32.mxu1 %v689_v58 }
 0x18b   :  { %v1046_v6 = vpack.c.bf16 %v550_v4, %v545_v48  ;;  %v552_v8 = vpop.f32.mrb[67].mxu0 }
 0x18d   :  { %1047 = vmatpush1.bf16.msra.mxu1 %v1046_v6 }
 0x18e   :  { %v555_v29 = vpop.f32.mrb[68].mxu0  ;;  %1048 = vmatprep.subr.bf16.mxu1 %v1117_v0  ;;  %776 = vmatmul.mubr.f32.gmra.mrb[44].mxu1 %v688_v15 }
 0x18f   :  { %v557_v13 = vpop.f32.mrb[69].mxu0  ;;  %780 = vmatprep.mubr.f32.mxu1 %v693_v27 }
 0x192   :  { %v560_v39 = vpop.f32.mrb[70].mxu0  ;;  %781 = vmatmul.mubr.f32.gmra.mrb[46].mxu1 %v692_v14 }
 0x193   :  { %v1049_v52 = vpack.c.bf16 %v560_v39, %v555_v29  ;;  %v562_v61 = vpop.f32.mrb[71].mxu0  ;;  %945 = vmatprep.mubr.msk.f32.mxu1 %vm696_vm2, %v687_v42 }
 0x195   :  { %1050 = vmatpush1.bf16.msra.mxu1 %v1049_v52 }
 0x196   :  { %v565_v2 = vpop.f32.mrb[72].mxu0  ;;  %1051 = vmatprep.subr.bf16.mxu1 %v1117_v0 }
 0x197   :  { %v567_v18 = vpop.f32.mrb[73].mxu0 }
 0x19a   :  { %v570_v23 = vpop.f32.mrb[74].mxu0 }
 0x19b   :  { %v1052_v24 = vpack.c.bf16 %v570_v23, %v565_v2  ;;  %v572_v57 = vpop.f32.mrb[75].mxu0 }
 0x19d   :  { %1053 = vmatpush1.bf16.msra.mxu1 %v1052_v24 }
 0x19e   :  { %v575_v1 = vpop.f32.mrb[76].mxu0  ;;  %1054 = vmatprep.subr.bf16.mxu1 %v1117_v0 }
 0x19f   :  { %v1055_v28 = vpack.c.bf16 %v1587_v63, %v575_v1  ;;  %v577_v33 = vpop.f32.mrb[77].mxu0  ;;  %v686_v63 = vld [vmem:[%s1822_s1 + $0x10] sm:$0xff] }
 0x1a1   :  { %1056 = vmatpush1.bf16.msra.mxu1 %v1055_v28 }
 0x1a2   :  { %1057 = vmatprep.subr.bf16.mxu1 %v1117_v0 }
 0x1a5   :  { %1059 = vmatpush1.bf16.msra.mxu1 %v1058_v11  ;;  %v694_v11 = vld [vmem:[%s1822_s1 + $0x50] sm:$0xf] }
 0x1a6   :  { %1060 = vmatprep.subr.bf16.mxu1 %v1117_v0 }
 0x1a9   :  { %1062 = vmatpush1.bf16.msra.mxu1 %v1061_v21 }
 0x1aa   :  { %1063 = vmatprep.subr.bf16.mxu1 %v1117_v0 }
 0x1ad   :  { %1065 = vmatpush1.bf16.msra.mxu1 %v1064_v31 }
 0x1ae   :  { %1066 = vmatprep.subr.bf16.mxu1 %v1117_v0 }
 0x1b1   :  { %1068 = vmatpush1.bf16.msra.mxu1 %v1067_v41 }
 0x1b2   :  { %1069 = vmatprep.subr.bf16.mxu1 %v1117_v0 }
 0x1b5   :  { %1071 = vmatpush1.bf16.msra.mxu1 %v1070_v51 }
 0x1b6   :  { %1072 = vmatprep.subr.bf16.mxu1 %v1117_v0 }
 0x1b9   :  { %1074 = vmatpush1.bf16.msra.mxu1 %v1073_v62 }
 0x1ba   :  { %1075 = vmatprep.subr.bf16.mxu1 %v1117_v0 }
 0x1bd   :  { %1077 = vmatpush1.bf16.msra.mxu1 %v1076_v22 }
 0x1be   :  { %1078 = vmatprep.subr.bf16.mxu1 %v1117_v0 }
 0x1c1   :  { %1080 = vmatpush1.bf16.msra.mxu1 %v1079_v47 }
 0x1c2   :  { %1081 = vmatprep.subr.bf16.mxu1 %v1117_v0 }
 0x1c5   :  { %1083 = vmatpush1.bf16.msra.mxu1 %v1082_v25 }
 0x1c6   :  { %1084 = vmatprep.subr.bf16.mxu1 %v1117_v0  ;;  %v695_v0 = vld [vmem:[%s1822_s1 + $0x58] sm:$0xf] }
 0x1c9   :  { %1086 = vmatpush1.bf16.msra.mxu1 %v1085_v55 }
 0x1cc   :  { %851 = vmatmul.mubr.f32.vlgmr.msra.gmra.mrb[48].mxu1 %v686_v63 }
 0x1cd   :  { %946 = vmatprep.mubr.msk.f32.mxu1 %vm696_vm2, %v691_v5 }
 0x1d0   :  { %856 = vmatmul.mubr.f32.gmra.mrb[50].mxu1 %v690_v10 }
 0x1d1   :  { %947 = vmatprep.mubr.msk.f32.mxu1 %vm696_vm2, %v695_v0 }
 0x1d4   :  { %861 = vmatmul.mubr.f32.gmra.mrb[52].mxu1 %v694_v11 }
 0x25c   :  { %v980_v16 = vpop.f32.mrb[42].mxu1 }
 0x25d   :  { %v981_v20 = vpop.f32.mrb[43].mxu1 }
 0x25e   :  { %v982_v21 = vadd.f32 %v981_v20, %v980_v16 }
 0x261   :  { %v983_v26 = vpop.f32.mrb[44].mxu1 }
 0x262   :  { %v984_v30 = vpop.f32.mrb[45].mxu1 }
 0x263   :  { %v985_v31 = vadd.f32 %v984_v30, %v983_v26 }
 0x265   :  { %v986_v36 = vpop.f32.mrb[46].mxu1 }
 0x266   :  { %v987_v40 = vpop.f32.mrb[47].mxu1 }
 0x267   :  { %v988_v41 = vadd.f32 %v987_v40, %v986_v36 }
 0x29f   :  { %v852_v46 = vpop.f32.mrb[48].mxu1 }
 0x2a0   :  { %v853_v50 = vadd.f32 %v982_v21, %v852_v46  ;;  %v854_v51 = vpop.f32.mrb[49].mxu1 }
 0x2a2   :  { %v866_v60 = vmul.f32 0.0051020407, %v853_v50 }
 0x2a3   :  { %v857_v62 = vpop.f32.mrb[50].mxu1 }
 0x2a4   :  { %v872_v9 = vadd.f32 %v869_v56, %v866_v60  ;;  %v858_v19 = vadd.f32 %v985_v31, %v857_v62  ;;  %v859_v22 = vpop.f32.mrb[51].mxu1 }
 0x2a6   :  { %876 = vst.msk [vmem:[%s1824_s3] sm:$0xff] %vm875_vm3, %v872_v9  ;;  %v867_v45 = vmul.f32 0.0051020407, %v858_v19 }
 0x2a7   :  { %v862_v47 = vpop.f32.mrb[52].mxu1 }
 0x2a8   :  { %v873_v59 = vadd.f32 %v870_v35, %v867_v45  ;;  %v863_v17 = vadd.f32 %v988_v41, %v862_v47  ;;  %v864_v25 = vpop.f32.mrb[53].mxu1 }
 0x2aa   :  { %877 = vst.msk [vmem:[%s1824_s3 + $0x8] sm:$0xff] %vm875_vm3, %v873_v59  ;;  %v868_v3 = vmul.f32 0.0051020407, %v863_v17 }
 0x2ac   :  { %v874_v55 = vadd.f32 %v871_v49, %v868_v3 }
 0x2ae   :  { %879 = vst.msk [vmem:[%s1824_s3 + $0x10] sm:$0xf] %vm878_vm4, %v874_v55 }

</bundles_post_ra>
